<compile_context>
chip_gen: v7x
topology: tpu7x:2x2x1
jax: 0.10.0
libtpu: 0.0.40
codegen_flags: <defaults>
</compile_context>

<pallas_src>
import jax
import jax.numpy as jnp
from jax.experimental import pallas as pl
from jax.experimental.pallas import tpu as pltpu


_LANES = 1024            # lane-dense last dim (multiple of 128)
_MAX_ROW_TILE = 512      # (512, 1024) f32 tile = 2 MiB -> 8 MiB double-buffered in+out


def _round_up(v, m):
    return ((v + m - 1) // m) * m


# ----------------------------------------------------------------------------
# Identity (the base network's replaced fc head): tiled lane-dense VMEM copy.
# ----------------------------------------------------------------------------
def _copy_kernel(x_ref, o_ref):
    o_ref[...] = x_ref[...]


def _identity_copy(x):
    """Pallas identity: returns an array equal to x (same shape & dtype)."""
    orig_shape = x.shape
    dtype = x.dtype
    n = x.size
    if n == 0:
        return x

    flat = x.reshape(-1)
    rows = (n + _LANES - 1) // _LANES
    # Row tile: multiple of 8, capped so VMEM stays well inside default budgets.
    tr = min(_MAX_ROW_TILE, _round_up(rows, 8))
    rows_p = _round_up(rows, tr)
    n_p = rows_p * _LANES
    if n_p != n:
        flat = jnp.pad(flat, (0, n_p - n))
    x2 = flat.reshape(rows_p, _LANES)

    out2 = pl.pallas_call(
        _copy_kernel,
        out_shape=jax.ShapeDtypeStruct((rows_p, _LANES), dtype),
        grid=(rows_p // tr,),
        in_specs=[pl.BlockSpec((tr, _LANES), lambda i: (i, 0))],
        out_specs=pl.BlockSpec((tr, _LANES), lambda i: (i, 0)),
        compiler_params=pltpu.CompilerParams(
            dimension_semantics=("parallel",)
        ),
    )(x2)

    return out2.reshape(-1)[:n].reshape(orig_shape)


# ----------------------------------------------------------------------------
# Optional feature normalization: F.normalize(x, p=2, dim=1).
# ----------------------------------------------------------------------------
def _l2norm_kernel(x_ref, o_ref):
    x = x_ref[...].astype(jnp.float32)
    norm = jnp.sqrt(jnp.sum(x * x, axis=1, keepdims=True))
    o_ref[...] = (x / jnp.maximum(norm, 1e-12)).astype(o_ref.dtype)


def _l2_normalize_dim1(x):
    """L2-normalize along axis 1 (PyTorch F.normalize(p=2, dim=1, eps=1e-12))."""
    assert x.ndim >= 2, "dim=1 normalization requires rank >= 2"
    orig_dtype = x.dtype

    # Put the normalized axis on lanes so the reduction is a per-row lane reduce.
    moved = jnp.moveaxis(x, 1, -1)
    lead_shape = moved.shape[:-1]
    d1 = moved.shape[-1]
    x2 = moved.reshape(-1, d1)
    rows = x2.shape[0]

    tr = min(256, _round_up(rows, 8))
    rows_p = _round_up(rows, tr)
    if rows_p != rows:
        # Zero rows normalize to zero (0 / 1e-12) -- padded rows are dropped anyway.
        x2 = jnp.pad(x2, ((0, rows_p - rows), (0, 0)))

    out2 = pl.pallas_call(
        _l2norm_kernel,
        out_shape=jax.ShapeDtypeStruct((rows_p, d1), orig_dtype),
        grid=(rows_p // tr,),
        in_specs=[pl.BlockSpec((tr, d1), lambda i: (i, 0))],
        out_specs=pl.BlockSpec((tr, d1), lambda i: (i, 0)),
        compiler_params=pltpu.CompilerParams(
            dimension_semantics=("parallel",)
        ),
    )(x2)

    out = out2[:rows].reshape(lead_shape + (d1,))
    return jnp.moveaxis(out, -1, 1)


# ----------------------------------------------------------------------------
# AudioBaseNetwork.forward
# ----------------------------------------------------------------------------
def audio_base_network_forward(x, norm_feat=False):
    feat = _identity_copy(x)      # base head (Identity fc) as Pallas copy kernel
    feat = jnp.squeeze(feat)      # .squeeze()
    if norm_feat:
        feat = _l2_normalize_dim1(feat)
    return feat


if __name__ == "__main__":
    key = jax.random.PRNGKey(0)
    # Small NCHW input consistent with a conv-style audio model input.
    x = jax.random.normal(key, (2, 4, 16, 16), dtype=jnp.float32)

    # Default path (norm_feat=False): exact identity.
    y = audio_base_network_forward(x, norm_feat=False)
    jax.block_until_ready(y)
    assert y.shape == x.shape and y.dtype == x.dtype
    assert bool(jnp.all(y == x))

    # norm_feat=True path: L2 normalize along dim=1.
    y2 = audio_base_network_forward(x, norm_feat=True)
    jax.block_until_ready(y2)
    ref = x / jnp.maximum(jnp.sqrt(jnp.sum(x * x, axis=1, keepdims=True)), 1e-12)
    assert y2.shape == x.shape and y2.dtype == x.dtype
    assert bool(jnp.allclose(y2, ref, rtol=1e-5, atol=1e-6))

    print("KERNEL_OK")
</pallas_src>

<mosaic_0001>
module attributes {stable_mosaic.version = 11 : i64} {
  func.func @_copy_kernel(%arg0: i32, %arg1: memref<8x1024xf32, #tpu.memory_space<vmem>>, %arg2: memref<8x1024xf32, #tpu.memory_space<vmem>>) attributes {dimension_semantics = [#tpu.dimension_semantics<parallel>], iteration_bounds = array<i64: 1>, scalar_prefetch = 0 : i64, scratch_operands = 0 : i64, tpu.core_type = #tpu.core_type<tc>, window_params = [{transform_indices = @transform_0, window_bounds = array<i64: 8, 1024>}, {transform_indices = @transform_1, window_bounds = array<i64: 8, 1024>}]} {
    %c0 = arith.constant 0 : index
    %c0_0 = arith.constant 0 : index
    %0 = vector.load %arg1[%c0, %c0_0] : memref<8x1024xf32, #tpu.memory_space<vmem>>, vector<8x1024xf32>
    %c0_1 = arith.constant 0 : index
    %c0_2 = arith.constant 0 : index
    %1 = vector.load %arg2[%c0_1, %c0_2] : memref<8x1024xf32, #tpu.memory_space<vmem>>, vector<8x1024xf32>
    tpu.vector_store %arg2[%c0_1, %c0_2], %0 {strides = array<i32>} : memref<8x1024xf32, #tpu.memory_space<vmem>>, vector<8x1024xf32>,
    return
  }
  func.func @transform_0(%arg0: i32) -> (i32, i32) {
    %c0_i32 = arith.constant 0 : i32
    %c0_i32_0 = arith.constant 0 : i32
    return %arg0, %c0_i32 : i32, i32
  }
  func.func @transform_1(%arg0: i32) -> (i32, i32) {
    %c0_i32 = arith.constant 0 : i32
    %c0_i32_0 = arith.constant 0 : i32
    return %arg0, %c0_i32 : i32, i32
  }
}

</mosaic_0001>

<bundles_post_ra>
// kernel: tpu_custom_call.1
= control target key start
LH: loop header
LB: loop body
LE: loop exit
PB: predicated region body
PF: predicated region fallthrough
CT: control target
= control target key end

     0   :  { %6 = vsyncpa [#allocation3], 0  ;;  %s138_s0 = inlined_call_operand.hbm [shape: f32[8,1024], index: 0, kind: input, shape index: {}]   ;;  %s139_s1 = inlined_call_operand.hbm [shape: f32[8,1024], index: 1, kind: output, shape index: {}]  }
   0x1   :  { %7 = vsyncpa [#allocation4], 0  ;;  %s102_s6 = smov [#allocation2]   ;;  %s54_s10 = scalar_lea.hbm %s138_s0, 1024 }
   0x2   :  { %s14_s7 = sshll.u32 %s102_s6, 4  ;;  %p55_p0 = scmp.ne.s32.totalorder %s138_s0, %s54_s10  ;;  %s15_s7 = int_to_ptr.vmem [resolvable:$true] %s14_s7 }
   0x3   :  { %p58_p1 = scmp.lt.u32.totalorder %s54_s10, %s138_s0 }
   0x5   :  { %p60_p2 = pnand %p58_p1, %p55_p0 }
   0x7   :  { %63 = shalt.err (!%p60_p2)
}
   0x8   :  { %s64_s15 = scalar_lea.vmem %s15_s7, 1024  ;;  %p69_p4 = scmp.lt.s32.totalorder %s15_s7, %s15_s7 }
   0x9   :  { %p65_p3 = scmp.ne.s32.totalorder %s15_s7, %s64_s15  ;;  %p70_p5 = scmp.lt.s32.totalorder %s64_s15, %s64_s15 }
   0xb   :  { %p71_p6 = por %p70_p5, %p69_p4 }
   0xd   :  { %p72_p7 = pnand %p71_p6, %p65_p3 }
   0xf   :  { %75 = shalt.err (!%p72_p7)
}
  0x10   :  { %17 = dma.hbm_to_vmem [thread:$0]  %s138_s0, 1024, %s15_s7, [#allocation3]  }
  0x11   :  { %98 = dma.done.wait [#allocation3], 1024  }
  0x12   :  { %99 = vsyncadd [#allocation3], 4294966272  ;;  %s103_s18 = smov [#allocation5]   ;;  %v21_v0 = vld [vmem:[#allocation2] sm:$0xff]  ;;  %v22_v1 = vld [vmem:[#allocation2 + $0x8] sm:$0xff] }
  0x13   :  { %s43_s19 = sshll.u32 %s103_s18, 4  ;;  %v23_v2 = vld [vmem:[#allocation2 + $0x10] sm:$0xff]  ;;  %29 = vst [vmem:[#allocation5] sm:$0xff] %v21_v0  ;;  %30 = vst [vmem:[#allocation5 + $0x8] sm:$0xff] %v22_v1  ;;  %v24_v3 = vld [vmem:[#allocation2 + $0x18] sm:$0xff]  ;;  %s44_s19 = int_to_ptr.vmem [resolvable:$true] %s43_s19 }
  0x14   :  { %31 = vst [vmem:[#allocation5 + $0x10] sm:$0xff] %v23_v2  ;;  %v25_v4 = vld [vmem:[#allocation2 + $0x20] sm:$0xff]  ;;  %v26_v5 = vld [vmem:[#allocation2 + $0x28] sm:$0xff]  ;;  %32 = vst [vmem:[#allocation5 + $0x18] sm:$0xff] %v24_v3  ;;  %s76_s0 = scalar_lea.vmem %s44_s19, 1024  ;;  %p81_p9 = scmp.lt.s32.totalorder %s44_s19, %s44_s19 }
  0x15   :  { %33 = vst [vmem:[#allocation5 + $0x20] sm:$0xff] %v25_v4  ;;  %34 = vst [vmem:[#allocation5 + $0x28] sm:$0xff] %v26_v5  ;;  %v27_v6 = vld [vmem:[#allocation2 + $0x30] sm:$0xff]  ;;  %v28_v7 = vld [vmem:[#allocation2 + $0x38] sm:$0xff]  ;;  %p77_p8 = scmp.ne.s32.totalorder %s44_s19, %s76_s0  ;;  %p82_p10 = scmp.lt.s32.totalorder %s76_s0, %s76_s0 }
  0x16   :  { %35 = vst [vmem:[#allocation5 + $0x30] sm:$0xff] %v27_v6  ;;  %36 = vst [vmem:[#allocation5 + $0x38] sm:$0xff] %v28_v7 }
  0x17   :  { %p83_p11 = por %p82_p10, %p81_p9 }
  0x19   :  { %p84_p12 = pnand %p83_p11, %p77_p8 }
  0x1b   :  { %87 = shalt.err (!%p84_p12)
}
  0x1c   :  { %s88_s22 = scalar_lea.hbm %s139_s1, 1024 }
  0x1d   :  { %p89_p13 = scmp.ne.s32.totalorder %s139_s1, %s88_s22  ;;  %p92_p0 = scmp.lt.u32.totalorder %s88_s22, %s139_s1 }
  0x1f   :  { %p94_p1 = pnand %p92_p0, %p89_p13 }
  0x21   :  { %97 = shalt.err (!%p94_p1)
}
  0x22   :  { %46 = dma.vmem_to_hbm [thread:$0]  %s44_s19, 1024, %s139_s1, [#allocation4]  }
  0x23   :  { %100 = dma.done.wait [#allocation4], 1024  }
  0x24   :  { %101 = vsyncadd [#allocation4], 4294966272 }
  0x25   :  { %50 = vsyncpa [#allocation3], 1 }
  0x26   :  { %51 = vsyncpa [#allocation4], 1 }

</bundles_post_ra>
